<compile_context>
chip_gen: v6e
topology: v6e:2x2x1
jax: 0.10.0
libtpu: 0.0.40
codegen_flags: <defaults>
</compile_context>

<pallas_src>
import functools
import math

import jax
import jax.numpy as jnp
from jax import lax
from jax.experimental import pallas as pl
from jax.experimental.pallas import tpu as pltpu

_SUBLANE = 8
_LANE = 128
_TILE_BYTE_BUDGET = 4 * 1024 * 1024      # bytes per (double-buffered) input tile
_VMEM_LIMIT_BYTES = 32 * 1024 * 1024     # fits v5e/v6e/v7x physical VMEM


def _round_up(x, m):
    return ((x + m - 1) // m) * m


def _round_down(x, m):
    return (x // m) * m


# ---------------------------------------------------------------------------
# Kernel A: reduce over the sublane (middle) axis of a (pre, R, post) view.
# Grid = (pre, post lane-tiles, R sublane-tiles); reduction axis last.
# ---------------------------------------------------------------------------
def _sublane_reduce_kernel(x_ref, o_ref, acc_ref, *, inv_count, r_total, need_mask):
    k = pl.program_id(2)

    @pl.when(k == 0)
    def _init():
        acc_ref[...] = jnp.zeros_like(acc_ref)

    x = x_ref[0].astype(jnp.float32)                 # (tr, tpost)
    tr = x.shape[0]
    if need_mask:
        # Only generated when R % tr != 0: zero the out-of-bounds rows of the
        # last (partial) reduction tile.
        row = lax.broadcasted_iota(jnp.int32, (tr, 1), 0)
        x = jnp.where(row < (r_total - k * tr), x, 0.0)

    if acc_ref.shape[0] == _SUBLANE:
        # Partial sums per 8-row sublane group: pure VPU adds every step; the
        # single 8 -> 1 cross-sublane (XLU) reduce happens only in finalize.
        acc_ref[...] += jnp.sum(
            x.reshape(tr // _SUBLANE, _SUBLANE, x.shape[1]), axis=0)
    else:
        # tr == R and R not a multiple of 8: single reduction tile.
        acc_ref[...] += jnp.sum(x, axis=0, keepdims=True)

    @pl.when(k == pl.num_programs(2) - 1)
    def _finalize():
        total = jnp.sum(acc_ref[...], axis=0, keepdims=True)      # (1, tpost)
        o_ref[...] = (total * inv_count).astype(o_ref.dtype).reshape(o_ref.shape)


def _mean_over_sublane(x3, out_dtype):
    pre, r, post = x3.shape
    itemsize = jnp.dtype(x3.dtype).itemsize
    sub_mult = _SUBLANE * max(1, 4 // itemsize)      # dtype-aware sublane packing

    # Kept/lane tile (lane-dense output stores).
    tpost = post if post <= 2048 else 2048
    # Guarantee >= 2 "parallel" blocks when possible (keeps TC #2 busy on v7x).
    if pre == 1 and tpost >= post and post >= 2 * _LANE:
        tpost = _round_up(-(-post // 2), _LANE)

    # Reduction/sublane tile from the byte budget.
    rows_budget = max(sub_mult, _TILE_BYTE_BUDGET // (tpost * itemsize))
    if r <= rows_budget:
        tr = r                                        # full dim: always legal
    else:
        tr = max(sub_mult, _round_down(rows_budget, sub_mult))

    need_mask = (tr < r) and (r % tr != 0)
    acc_rows = _SUBLANE if tr % _SUBLANE == 0 else 1
    grid = (pre, pl.cdiv(post, tpost), pl.cdiv(r, tr))

    kernel = functools.partial(
        _sublane_reduce_kernel, inv_count=1.0 / r, r_total=r, need_mask=need_mask)
    return pl.pallas_call(
        kernel,
        out_shape=jax.ShapeDtypeStruct((pre, 1, post), out_dtype),
        grid=grid,
        in_specs=[pl.BlockSpec((1, tr, tpost), lambda i, j, k: (i, k, j))],
        out_specs=pl.BlockSpec((1, 1, tpost), lambda i, j, k: (i, 0, j)),
        scratch_shapes=[pltpu.VMEM((acc_rows, tpost), jnp.float32)],
        compiler_params=pltpu.CompilerParams(
            dimension_semantics=("parallel", "parallel", "arbitrary"),
            vmem_limit_bytes=_VMEM_LIMIT_BYTES,
        ),
        cost_estimate=pl.CostEstimate(
            flops=pre * r * post,
            transcendentals=0,
            bytes_accessed=pre * r * post * itemsize
            + pre * post * jnp.dtype(out_dtype).itemsize,
        ),
    )(x3)


# ---------------------------------------------------------------------------
# Kernel B: reduce over the lane (last) axis of an (M, R) view (trailing
# reduced axes).  Grid = (M sublane-tiles, R lane-tiles); reduction axis last.
# ---------------------------------------------------------------------------
def _lane_reduce_kernel(x_ref, o_ref, acc_ref, *, inv_count, r_total, need_mask):
    k = pl.program_id(1)

    @pl.when(k == 0)
    def _init():
        acc_ref[...] = jnp.zeros_like(acc_ref)

    x = x_ref[...].astype(jnp.float32)               # (tm, tr)
    if need_mask:
        col = lax.broadcasted_iota(jnp.int32, x.shape, 1)
        x = jnp.where(col < (r_total - k * x.shape[1]), x, 0.0)
    # Lowered as lane-tile-wise VPU adds + one cross-lane reduce per row; the
    # kernel stays HBM-bound so this is hidden under the DMA.
    acc_ref[...] += jnp.sum(x, axis=1, keepdims=True)

    @pl.when(k == pl.num_programs(1) - 1)
    def _finalize():
        o_ref[...] = (acc_ref[...] * inv_count).astype(o_ref.dtype)


def _mean_over_lane(x2, out_dtype):
    m, r = x2.shape
    itemsize = jnp.dtype(x2.dtype).itemsize
    sub_mult = _SUBLANE * max(1, 4 // itemsize)

    tm = m if m <= 512 else 512
    # Guarantee >= 2 blocks along the "parallel" kept axis when m allows it.
    if tm >= m and m >= 2 * sub_mult:
        tm = _round_up(-(-m // 2), sub_mult)

    lanes_budget = max(_LANE, _TILE_BYTE_BUDGET // (tm * itemsize))
    if r <= lanes_budget:
        tr = r                                        # full dim: always legal
    else:
        tr = max(_LANE, _round_down(lanes_budget, _LANE))

    need_mask = (tr < r) and (r % tr != 0)
    grid = (pl.cdiv(m, tm), pl.cdiv(r, tr))

    kernel = functools.partial(
        _lane_reduce_kernel, inv_count=1.0 / r, r_total=r, need_mask=need_mask)
    return pl.pallas_call(
        kernel,
        out_shape=jax.ShapeDtypeStruct((m, 1), out_dtype),
        grid=grid,
        in_specs=[pl.BlockSpec((tm, tr), lambda i, k: (i, k))],
        out_specs=pl.BlockSpec((tm, 1), lambda i, k: (i, 0)),
        scratch_shapes=[pltpu.VMEM((tm, 1), jnp.float32)],
        compiler_params=pltpu.CompilerParams(
            dimension_semantics=("parallel", "arbitrary"),
            vmem_limit_bytes=_VMEM_LIMIT_BYTES,
        ),
        cost_estimate=pl.CostEstimate(
            flops=m * r,
            transcendentals=0,
            bytes_accessed=m * r * itemsize + m * jnp.dtype(out_dtype).itemsize,
        ),
    )(x2)


# ---------------------------------------------------------------------------
# Wrapper: BoundReduceMean.forward semantics.
# ---------------------------------------------------------------------------
def bound_reduce_mean(x, axes, keepdim=True):
    """Pallas implementation of BoundReduceMean.forward: mean of x over `axes`."""
    if isinstance(axes, int):
        axes = (axes,)
    ndim = x.ndim
    axes = tuple(sorted(a % ndim for a in axes))
    kept = tuple(a for a in range(ndim) if a not in axes)
    kept_shape = tuple(x.shape[a] for a in kept)
    r_count = math.prod(x.shape[a] for a in axes)
    m_count = math.prod(kept_shape) if kept_shape else 1

    contiguous = axes == tuple(range(axes[0], axes[0] + len(axes)))
    if contiguous:
        pre = math.prod(x.shape[: axes[0]])
        post = math.prod(x.shape[axes[-1] + 1:])
        if post == 1:
            # Trailing reduced axes: free reshape, reduce over the lane axis.
            out = _mean_over_lane(x.reshape(pre, r_count), x.dtype)           # (pre, 1)
        else:
            # Leading/middle contiguous block: free reshape, sublane reduction.
            out = _mean_over_sublane(x.reshape(pre, r_count, post), x.dtype)  # (pre, 1, post)
    else:
        # Rare path: genuinely non-contiguous reduced axes need one transpose.
        xt = jnp.transpose(x, axes + kept).reshape(1, r_count, m_count)
        out = _mean_over_sublane(xt, x.dtype)                                 # (1, 1, M)

    res = out.reshape(kept_shape)
    if keepdim:
        res = jnp.expand_dims(res, axes)
    return res


if __name__ == "__main__":
    key = jax.random.PRNGKey(0)
    k0, k1 = jax.random.split(key)
    # Shapes implied by BoundReduceMean usage: (batch, seq, hidden).
    x = jax.random.normal(k0, (2, 8, 32), dtype=jnp.float32)

    # Case 1: mean over hidden (trailing axis -> lane-reduction kernel), keepdim.
    out1 = jax.block_until_ready(bound_reduce_mean(x, axes=[-1], keepdim=True))
    ref1 = jnp.mean(x, axis=-1, keepdims=True)
    assert out1.shape == ref1.shape, (out1.shape, ref1.shape)
    assert jnp.allclose(out1, ref1, atol=1e-5, rtol=1e-5)

    # Case 2: mean over seq (middle axis -> sublane kernel, no transpose), no keepdim.
    out2 = jax.block_until_ready(bound_reduce_mean(x, axes=[1], keepdim=False))
    ref2 = jnp.mean(x, axis=1, keepdims=False)
    assert out2.shape == ref2.shape, (out2.shape, ref2.shape)
    assert jnp.allclose(out2, ref2, atol=1e-5, rtol=1e-5)

    # Case 3: mean over (seq, hidden) (trailing block -> lane-reduction kernel).
    out3 = jax.block_until_ready(bound_reduce_mean(x, axes=[1, 2], keepdim=True))
    ref3 = jnp.mean(x, axis=(1, 2), keepdims=True)
    assert out3.shape == ref3.shape, (out3.shape, ref3.shape)
    assert jnp.allclose(out3, ref3, atol=1e-5, rtol=1e-5)

    # Case 4: non-contiguous reduced axes on a 4-D input (transpose fallback).
    x4 = jax.random.normal(k1, (2, 4, 16, 16), dtype=jnp.float32)
    out4 = jax.block_until_ready(bound_reduce_mean(x4, axes=[1, 3], keepdim=True))
    ref4 = jnp.mean(x4, axis=(1, 3), keepdims=True)
    assert out4.shape == ref4.shape, (out4.shape, ref4.shape)
    assert jnp.allclose(out4, ref4, atol=1e-5, rtol=1e-5)

    print("KERNEL_OK")
</pallas_src>

<mosaic_0001>
module attributes {stable_mosaic.version = 11 : i64} {
  func.func @_lane_reduce_kernel(%arg0: i32, %arg1: i32, %arg2: memref<8x32xf32, #tpu.memory_space<vmem>>, %arg3: memref<8x1xf32, #tpu.memory_space<vmem>>, %arg4: memref<8x1xf32, #tpu.memory_space<vmem>>) attributes {dimension_semantics = [#tpu.dimension_semantics<parallel>, #tpu.dimension_semantics<arbitrary>], iteration_bounds = array<i64: 2, 1>, scalar_prefetch = 0 : i64, scratch_operands = 1 : i64, tpu.core_type = #tpu.core_type<tc>, window_params = [{transform_indices = @transform_0, window_bounds = array<i64: 8, 32>}, {transform_indices = @transform_1, window_bounds = array<i64: 8, 1>}]} {
    %c0_i32 = arith.constant 0 : i32
    %0 = arith.cmpi eq, %arg1, %c0_i32 : i32
    %1 = arith.extui %0 : i1 to i32
    %c0_i32_0 = arith.constant 0 : i32
    %2 = arith.cmpi ne, %1, %c0_i32_0 : i32
    scf.if %2 {
      %cst_8 = arith.constant 0.000000e+00 : f32
      %12 = vector.broadcast %cst_8 : f32 to vector<8x1xf32>
      %c0_9 = arith.constant 0 : index
      %c0_10 = arith.constant 0 : index
      %13 = vector.load %arg4[%c0_9, %c0_10] : memref<8x1xf32, #tpu.memory_space<vmem>>, vector<8x1xf32>
      tpu.vector_store %arg4[%c0_9, %c0_10], %12 {strides = array<i32>} : memref<8x1xf32, #tpu.memory_space<vmem>>, vector<8x1xf32>,
    } else {
    }
    %c0 = arith.constant 0 : index
    %c0_1 = arith.constant 0 : index
    %3 = vector.load %arg2[%c0, %c0_1] : memref<8x32xf32, #tpu.memory_space<vmem>>, vector<8x32xf32>
    %c0_2 = arith.constant 0 : index
    %c0_3 = arith.constant 0 : index
    %4 = vector.load %arg4[%c0_2, %c0_3] : memref<8x1xf32, #tpu.memory_space<vmem>>, vector<8x1xf32>
    %cst = arith.constant dense<0.000000e+00> : vector<8xf32>
    %5 = vector.multi_reduction <add>, %3, %cst [1] : vector<8x32xf32> to vector<8xf32>
    %6 = vector.shape_cast %5 : vector<8xf32> to vector<8x1xf32>
    %7 = arith.addf %4, %6 : vector<8x1xf32>
    %c0_4 = arith.constant 0 : index
    %c0_5 = arith.constant 0 : index
    %8 = vector.load %arg4[%c0_4, %c0_5] : memref<8x1xf32, #tpu.memory_space<vmem>>, vector<8x1xf32>
    tpu.vector_store %arg4[%c0_4, %c0_5], %7 {strides = array<i32>} : memref<8x1xf32, #tpu.memory_space<vmem>>, vector<8x1xf32>,
    %c0_i32_6 = arith.constant 0 : i32
    %9 = arith.cmpi eq, %arg1, %c0_i32_6 : i32
    %10 = arith.extui %9 : i1 to i32
    %c0_i32_7 = arith.constant 0 : i32
    %11 = arith.cmpi ne, %10, %c0_i32_7 : i32
    scf.if %11 {
      %c0_8 = arith.constant 0 : index
      %c0_9 = arith.constant 0 : index
      %12 = vector.load %arg4[%c0_8, %c0_9] : memref<8x1xf32, #tpu.memory_space<vmem>>, vector<8x1xf32>
      %cst_10 = arith.constant 3.125000e-02 : f32
      %13 = vector.broadcast %cst_10 : f32 to vector<8x1xf32>
      %14 = arith.mulf %12, %13 : vector<8x1xf32>
      %c0_11 = arith.constant 0 : index
      %c0_12 = arith.constant 0 : index
      %15 = vector.load %arg3[%c0_11, %c0_12] : memref<8x1xf32, #tpu.memory_space<vmem>>, vector<8x1xf32>
      tpu.vector_store %arg3[%c0_11, %c0_12], %14 {strides = array<i32>} : memref<8x1xf32, #tpu.memory_space<vmem>>, vector<8x1xf32>,
    } else {
    }
    return
  }
  func.func @transform_0(%arg0: i32, %arg1: i32) -> (i32, i32) {
    %c0_i32 = arith.constant 0 : i32
    return %arg0, %arg1 : i32, i32
  }
  func.func @transform_1(%arg0: i32, %arg1: i32) -> (i32, i32) {
    %c0_i32 = arith.constant 0 : i32
    %c0_i32_0 = arith.constant 0 : i32
    return %arg0, %c0_i32 : i32, i32
  }
}

</mosaic_0001>

<bundles_post_ra>
// kernel: tpu_custom_call.1
= control target key start
LH: loop header
LB: loop body
LE: loop exit
PB: predicated region body
PF: predicated region fallthrough
CT: control target
= control target key end

     0   :  { %6 = vsyncpa [#allocation4], 0  ;;  %s504_s0 = inlined_call_operand.hbm [shape: f32[16,32], index: 0, kind: input, shape index: {}]   ;;  %s505_s1 = inlined_call_operand.vmem [shape: f32[16,1], index: 1, kind: output, shape index: {}]  }
   0x1   :  { %8 = vsyncpa [#allocation4 + $0x1], 0  ;;  %s401_s6 = smov 0   ;;  %s403_s7 = smov 0  }
   0x2   :  { %s405_s8 = smov 0   ;;  %s407_s9 = smov 0  }
   0x3   :  { %s409_s10 = smov 0   ;;  %s411_s11 = smov 0  }
   0x4 LB: > { %s242_s12 = sadd.s32 4294967295, %s387_s11   ;;  %s26_s13 = sadd.s32 1, %s383_s10  ;;  %s387_s11 = sphi %s411_s11, %s14_s11   ;;  %s383_s10 = sphi %s409_s10, %s513_s10   ;;  %s379_s9 = sphi %s407_s9, %s512_s9   ;;  %s375_s8 = sphi %s405_s8, %s511_s8   ;;  %s371_s7 = sphi %s403_s7, %s510_s7   ;;  %s367_s6 = sphi %s401_s6, %s509_s6  }
   0x5   : > { %p28_p0 = scmp.ge.s32.totalorder %s26_s13, 2  ;;  %s35_s14 = sadd.s32 1, %s375_s8 }
   0x6   : > { %p42_p1 = scmp.ne.s32.totalorder %s375_s8, %s371_s7  ;;  %p43_p2 = scmp.eq.s32.totalorder %s387_s11, 0 }
   0x7   : > { %s515_s13 = smov (%p28_p0, %s26_s13), 0  ;;  %p48_p4 = scmp.ne.s32.totalorder %s371_s7, %s367_s6 }
   0x8   : > { %p437_p3 = por %p43_p2, %p42_p1  ;;  %s30_s16 = ssub.s32 %s383_s10, %s515_s13 }
   0x9   : > { %p49_p5 = scmp.eq.s32.totalorder %s242_s12, 0  ;;  %p33_p6 = scmp.eq.s32.totalorder %s30_s16, 0 }
   0xa   : > { %p259_p8 = scmp.lt.s32.totalorder %s387_s11, 2  ;;  %s98_s19 = sand.u32 1, %s375_s8  }
   0xb   : > { %p444_p7 = por %p49_p5, %p48_p4  ;;  %s247_s20 = sshll.u32 %s383_s10, 7 }
   0xc   : > { %s450_s18 = scalar_select %p33_p6, %s375_s8, %s35_s14  }
   0xd   : > { %s246_s21 = sshll.u32 %s98_s19, 3  ;;  %s108_s24 = scalar_lea.hbm %s504_s0, %s247_s20 }
   0xe   : > { %s102_s25 = scalar_lea.vmem [#allocation3], %s246_s21  ;;  %p459_p9 = pnand %p259_p8, %p437_p3 }
   0xf   : > { %s110_s26 = sshll.u32 %s102_s25, 4  ;;  %p248_p10 = scmp.ge.s32.totalorder %s387_s11, 1  ;;  %s111_s26 = int_to_ptr.vmem [resolvable:$true] %s110_s26 }
  0x10   : > { %p115_p11 = scmp.lt.s32.totalorder %s387_s11, 3  ;;  %s99_s28 = scalar_lea.sflag [#allocation4], %s98_s19 }
  0x11   : > { %p311_p12 = pneg %p459_p9  ;;  %s322_s29 = scalar_lea.vmem %s111_s26, 128 }
  0x12   : > { %p323_p13 = scmp.ne.s32.totalorder %s111_s26, %s322_s29  ;;  %s389_s30 = smov [#allocation3]  }
  0x13   : > { %s327_s2 = sshll.u32 %s389_s30, 4  ;;  %s328_s2 = int_to_ptr.vmem [resolvable:$false] %s327_s2 }
  0x14   : > { %p325_p0 = pnand %p323_p13, %p311_p12  ;;  %s329_s3 = scalar_lea.vmem %s328_s2, 256 }
  0x15   : > { %p330_p2 = scmp.lt.s32.totalorder %s111_s26, %s328_s2  ;;  %p331_p3 = scmp.lt.s32.totalorder %s329_s3, %s322_s29 }
  0x16   : > { %p326_p1 = pneg %p325_p0 }
  0x17   : > { %p332_p4 = por %p331_p3, %p330_p2 }
  0x19   : > { %p333_p5 = pnand %p332_p4, %p326_p1 }
  0x1b   : > { %336 = shalt.err (!%p333_p5)
}
  0x1c   : > { %258 = dma.hbm_to_vmem [thread:$0]  (!%p459_p9), %s108_s24, 128, %s111_s26, %s99_s28  }
  0x1d   : > { %p116_p6 = pnand %p248_p10, %p115_p11 }
  0x1e   : > { %s121_s4 = sand.u32 (!%p116_p6), 1, %s371_s7  }
  0x1f   : > { %119 = sbr.rel (%p116_p6) target bundleno = 190 (0xbe), region = 24  ;;  %s249_s5 = sshll.u32 (!%p116_p6), %s121_s4, 3 }
  0x20   : > { %s122_s6 = scalar_lea.sflag (!%p116_p6), [#allocation4], %s121_s4  ;;  %s125_s12 = scalar_lea.vmem (!%p116_p6), [#allocation3], %s249_s5 }
  0x24   : > { %362 = dma.done.wait (%p444_p7), %s122_s6, 128  }
  0x25   : > { %364 = vsyncadd (%p444_p7), %s122_s6, 4294967168  ;;  %vm151_vm0 = vcmask 7168   ;;  %v390_v0 = vmov 0.0   ;;  %vm155_vm1 = vcmask 261120   ;;  %v153_v1 = vld [vmem:[%s125_s12] sm:$0xff]  ;;  %p143_p8 = scmp.lt.s32.totalorder %s379_s9, 1 }
  0x26   : > { %152 = vst.msk [vmem:[#allocation2] sm:$0xff] %vm151_vm0, %v390_v0  ;;  %v156_v2 = vsel %vm155_vm1, %v153_v1, 0.0 }
  0x27   : > { %157 = vadd.xlane.f32.xlu0 %v156_v2  ;;  %s517_s9 = smov (!%p143_p8, %s379_s9), 1 }
  0x28   : > { %s250_s14 = sshll.u32 %s517_s9, 3 }
  0x29   : > { %s146_s17 = scalar_lea.vmem %s505_s1, %s250_s14 }
  0x2d   : > { %v154_v3 = vld [vmem:[#allocation2] sm:$0xff] }
  0xb0   : > { %v158_v4 = vpop.xlane.xlu0 %157 }
  0xb1   : > { %v159_v5 = vadd.f32 %v158_v4, %v154_v3 }
  0xb3   : > { %161 = vst.msk [vmem:[#allocation2] sm:$0xff] %vm151_vm0, %v159_v5 }
  0xba   : > { %v165_v6 = vld [vmem:[#allocation2] sm:$0xff] }
  0xbb   : > { %v166_v7 = vmul.f32 0.03125, %v165_v6 }
  0xbd   : > { %167 = vst.msk [vmem:[%s146_s17] sm:$0xff] %vm151_vm0, %v166_v7 }
  0xbe PF: > { %s14_s11 = sadd.s32 1, %s387_s11   ;;  %s509_s6 = smov %s371_s7 }
  0xbf   : > { %p11_p7 = scmp.ge.s32.totalorder %s14_s11, 4   ;;  %s510_s7 = smov %s375_s8 }
  0xc0   : > { %s511_s8 = smov %s450_s18  ;;  %s512_s9 = smov %s383_s10 }
  0xc1   : > { %s513_s10 = smov %s515_s13  ;;  %13 = sbr.rel (!%p11_p7) target bundleno = 4 (0x4), region = 72 }
  0xc6   :  { %187 = vsyncpa [#allocation4], 1 }
  0xc7   :  { %189 = vsyncpa [#allocation4 + $0x1], 1 }

</bundles_post_ra>
